<compile_context>
chip_gen: v7x
topology: tpu7x:2x2x1
jax: 0.10.0
libtpu: 0.0.40
codegen_flags: <defaults>
</compile_context>

<pallas_src>
import jax
import jax.numpy as jnp
from jax import lax
from jax.experimental import pallas as pl
from jax.experimental.pallas import tpu as pltpu

IN_FEATURES = 25
HIDDEN = 256
OUT_FEATURES = 5

F_PAD = 128      # padded input-feature width (lane-aligned)
O_PAD = 128      # padded output-logit width (lane-aligned)
TILE_B = 256     # batch rows per grid step


def _mlp_argmax_kernel(x_ref, w1_ref, b1_ref, w2_ref, b2_ref, w3_ref, b3_ref,
                       out_ref, xpad_ref):
    # Zero-extend the 25 real input features to 128 lanes inside VMEM
    # (avoids any per-call padded HBM copy of x).
    xpad_ref[...] = jnp.zeros_like(xpad_ref)
    xpad_ref[:, :IN_FEATURES] = x_ref[...]

    # Layer 1: [TB, 128] @ [128, 256]  (bf16 x bf16 -> f32 accumulate), bias + ReLU in f32.
    h1 = jnp.dot(xpad_ref[...].astype(jnp.bfloat16), w1_ref[...],
                 preferred_element_type=jnp.float32)
    h1 = jnp.maximum(h1 + b1_ref[...], 0.0)

    # Layer 2: [TB, 256] @ [256, 256]
    h2 = jnp.dot(h1.astype(jnp.bfloat16), w2_ref[...],
                 preferred_element_type=jnp.float32)
    h2 = jnp.maximum(h2 + b2_ref[...], 0.0)

    # Layer 3 (logits): [TB, 256] @ [256, 128]
    q = jnp.dot(h2.astype(jnp.bfloat16), w3_ref[...],
                preferred_element_type=jnp.float32)
    q = q + b3_ref[...]

    # Mask padded logit columns so they can never win the argmax.
    col = lax.broadcasted_iota(jnp.int32, q.shape, 1)
    q = jnp.where(col < OUT_FEATURES, q, -jnp.inf)

    # argmax along dim=1, first occurrence on ties (matches jnp / torch argmax).
    max_val = jnp.max(q, axis=-1, keepdims=True)
    idx = jnp.min(jnp.where(q == max_val, col, jnp.int32(O_PAD)),
                  axis=-1, keepdims=True)
    out_ref[...] = idx.astype(jnp.int32)


def prepare_params(w1, b1, w2, b2, w3, b3):
    """One-time weight prep: pad to TPU-friendly tiles and cast weights to bf16.

    Call once after loading/initializing the f32 weights; pass the result to
    torch_mlp_forward on every call (no per-call padding in the hot path).
    """
    w1_p = (jnp.zeros((F_PAD, HIDDEN), jnp.float32)
            .at[:IN_FEATURES, :].set(w1).astype(jnp.bfloat16))
    b1_p = b1.reshape(1, HIDDEN).astype(jnp.float32)
    w2_p = w2.astype(jnp.bfloat16)
    b2_p = b2.reshape(1, HIDDEN).astype(jnp.float32)
    w3_p = (jnp.zeros((HIDDEN, O_PAD), jnp.float32)
            .at[:, :OUT_FEATURES].set(w3).astype(jnp.bfloat16))
    b3_p = jnp.zeros((1, O_PAD), jnp.float32).at[:, :OUT_FEATURES].set(b3)
    return w1_p, b1_p, w2_p, b2_p, w3_p, b3_p


@jax.jit
def torch_mlp_forward(x, w1_p, b1_p, w2_p, b2_p, w3_p, b3_p):
    """x: [B, 25] float32, pre-padded bf16/f32 params -> int32 [B] argmax indices."""
    B = x.shape[0]
    tb = TILE_B if B >= TILE_B else max(8, ((B + 7) // 8) * 8)
    b_pad = ((B + tb - 1) // tb) * tb
    x_p = x if b_pad == B else jnp.pad(x, ((0, b_pad - B), (0, 0)))

    out = pl.pallas_call(
        _mlp_argmax_kernel,
        out_shape=jax.ShapeDtypeStruct((b_pad, 1), jnp.int32),
        grid=(b_pad // tb,),
        in_specs=[
            pl.BlockSpec((tb, IN_FEATURES), lambda i: (i, 0)),   # x: tiled over batch
            pl.BlockSpec((F_PAD, HIDDEN), lambda i: (0, 0)),     # w1: VMEM-resident
            pl.BlockSpec((1, HIDDEN), lambda i: (0, 0)),         # b1
            pl.BlockSpec((HIDDEN, HIDDEN), lambda i: (0, 0)),    # w2
            pl.BlockSpec((1, HIDDEN), lambda i: (0, 0)),         # b2
            pl.BlockSpec((HIDDEN, O_PAD), lambda i: (0, 0)),     # w3
            pl.BlockSpec((1, O_PAD), lambda i: (0, 0)),          # b3
        ],
        out_specs=pl.BlockSpec((tb, 1), lambda i: (i, 0)),
        scratch_shapes=[pltpu.VMEM((tb, F_PAD), jnp.float32)],   # lane-padded x staging
        compiler_params=pltpu.CompilerParams(
            dimension_semantics=("parallel",)),
    )(x_p, w1_p, b1_p, w2_p, b2_p, w3_p, b3_p)

    return out[:B, 0]


def init_params(key):
    """Deterministic parameter init mimicking nn.Linear's uniform(-1/sqrt(fan_in), +)."""
    ks = jax.random.split(key, 6)

    def lin(kw, kb, fan_in, fan_out):
        bound = 1.0 / jnp.sqrt(fan_in)
        w = jax.random.uniform(kw, (fan_in, fan_out), jnp.float32, -bound, bound)
        b = jax.random.uniform(kb, (fan_out,), jnp.float32, -bound, bound)
        return w, b

    w1, b1 = lin(ks[0], ks[1], IN_FEATURES, HIDDEN)
    w2, b2 = lin(ks[2], ks[3], HIDDEN, HIDDEN)
    w3, b3 = lin(ks[4], ks[5], HIDDEN, OUT_FEATURES)
    return w1, b1, w2, b2, w3, b3


def _reference_logits(x, w1, b1, w2, b2, w3, b3):
    h1 = jnp.maximum(x @ w1 + b1, 0.0)
    h2 = jnp.maximum(h1 @ w2 + b2, 0.0)
    return h2 @ w3 + b3


if __name__ == "__main__":
    key = jax.random.PRNGKey(0)
    k_x, k_p = jax.random.split(key)

    B = 8
    x = jax.random.normal(k_x, (B, IN_FEATURES), jnp.float32)
    raw_params = init_params(k_p)
    params = prepare_params(*raw_params)     # one-time prep (outside the hot path)

    out = torch_mlp_forward(x, *params)
    out = jax.block_until_ready(out)
    assert out.shape == (B,), out.shape

    # Correctness: the kernel uses bf16 weights, so compare against f32 reference logits
    # with a tolerance on the selected logit (tie-adjacent picks are acceptable).
    q_ref = _reference_logits(x, *raw_params)
    picked = q_ref[jnp.arange(B), out]
    best = jnp.max(q_ref, axis=1)
    assert bool(jnp.all(picked >= best - 5e-2)), (out, jnp.argmax(q_ref, axis=1))

    print("KERNEL_OK")
</pallas_src>

<mosaic_0001>
module attributes {stable_mosaic.version = 11 : i64} {
  func.func @_mlp_argmax_kernel(%arg0: i32, %arg1: memref<8x25xf32, #tpu.memory_space<vmem>>, %arg2: memref<128x256xbf16, #tpu.memory_space<vmem>>, %arg3: memref<1x256xf32, #tpu.memory_space<vmem>>, %arg4: memref<256x256xbf16, #tpu.memory_space<vmem>>, %arg5: memref<1x256xf32, #tpu.memory_space<vmem>>, %arg6: memref<256x128xbf16, #tpu.memory_space<vmem>>, %arg7: memref<1x128xf32, #tpu.memory_space<vmem>>, %arg8: memref<8x1xi32, #tpu.memory_space<vmem>>, %arg9: memref<8x128xf32, #tpu.memory_space<vmem>>) attributes {dimension_semantics = [#tpu.dimension_semantics<parallel>], iteration_bounds = array<i64: 1>, scalar_prefetch = 0 : i64, scratch_operands = 1 : i64, tpu.core_type = #tpu.core_type<tc>, window_params = [{transform_indices = @transform_0, window_bounds = array<i64: 8, 25>}, {pipeline_mode = #tpu.pipeline_mode<synchronous>, transform_indices = @transform_1, window_bounds = array<i64: 128, 256>}, {pipeline_mode = #tpu.pipeline_mode<synchronous>, transform_indices = @transform_2, window_bounds = array<i64: 1, 256>}, {pipeline_mode = #tpu.pipeline_mode<synchronous>, transform_indices = @transform_3, window_bounds = array<i64: 256, 256>}, {pipeline_mode = #tpu.pipeline_mode<synchronous>, transform_indices = @transform_4, window_bounds = array<i64: 1, 256>}, {pipeline_mode = #tpu.pipeline_mode<synchronous>, transform_indices = @transform_5, window_bounds = array<i64: 256, 128>}, {pipeline_mode = #tpu.pipeline_mode<synchronous>, transform_indices = @transform_6, window_bounds = array<i64: 1, 128>}, {transform_indices = @transform_7, window_bounds = array<i64: 8, 1>}]} {
    %cst = arith.constant 0.000000e+00 : f32
    %0 = vector.broadcast %cst : f32 to vector<8x128xf32>
    %c0 = arith.constant 0 : index
    %c0_0 = arith.constant 0 : index
    %1 = vector.load %arg9[%c0, %c0_0] : memref<8x128xf32, #tpu.memory_space<vmem>>, vector<8x128xf32>
    tpu.vector_store %arg9[%c0, %c0_0], %0 {strides = array<i32>} : memref<8x128xf32, #tpu.memory_space<vmem>>, vector<8x128xf32>,
    %c0_1 = arith.constant 0 : index
    %c0_2 = arith.constant 0 : index
    %2 = vector.load %arg1[%c0_1, %c0_2] : memref<8x25xf32, #tpu.memory_space<vmem>>, vector<8x25xf32>
    %c0_3 = arith.constant 0 : index
    %c0_4 = arith.constant 0 : index
    %3 = vector.load %arg9[%c0_3, %c0_4] : memref<8x128xf32, #tpu.memory_space<vmem>>, vector<8x25xf32>
    tpu.vector_store %arg9[%c0_3, %c0_4], %2 {strides = array<i32>} : memref<8x128xf32, #tpu.memory_space<vmem>>, vector<8x25xf32>,
    %c0_5 = arith.constant 0 : index
    %c0_6 = arith.constant 0 : index
    %4 = vector.load %arg9[%c0_5, %c0_6] : memref<8x128xf32, #tpu.memory_space<vmem>>, vector<8x128xf32>
    %5 = arith.truncf %4 : vector<8x128xf32> to vector<8x128xbf16>
    %c0_7 = arith.constant 0 : index
    %c0_8 = arith.constant 0 : index
    %6 = vector.load %arg2[%c0_7, %c0_8] : memref<128x256xbf16, #tpu.memory_space<vmem>>, vector<128x256xbf16>
    %cst_9 = arith.constant dense<0.000000e+00> : vector<8x256xf32>
    %7 = tpu.matmul %5, %6, %cst_9 {dimension_numbers = #tpu.dot_dimension_numbers<[1], [0], [0], [1], [0, 0, 1, 1], [], []>} : vector<8x128xbf16>, vector<128x256xbf16>, vector<8x256xf32> -> vector<8x256xf32>
    %c0_10 = arith.constant 0 : index
    %c0_11 = arith.constant 0 : index
    %8 = vector.load %arg3[%c0_10, %c0_11] : memref<1x256xf32, #tpu.memory_space<vmem>>, vector<1x256xf32>
    %9 = vector.broadcast %8 : vector<1x256xf32> to vector<8x256xf32>
    %10 = arith.addf %7, %9 : vector<8x256xf32>
    %cst_12 = arith.constant 0.000000e+00 : f32
    %11 = vector.broadcast %cst_12 : f32 to vector<8x256xf32>
    %12 = arith.maximumf %10, %11 : vector<8x256xf32>
    %13 = arith.truncf %12 : vector<8x256xf32> to vector<8x256xbf16>
    %c0_13 = arith.constant 0 : index
    %c0_14 = arith.constant 0 : index
    %14 = vector.load %arg4[%c0_13, %c0_14] : memref<256x256xbf16, #tpu.memory_space<vmem>>, vector<256x256xbf16>
    %cst_15 = arith.constant dense<0.000000e+00> : vector<8x256xf32>
    %15 = tpu.matmul %13, %14, %cst_15 {dimension_numbers = #tpu.dot_dimension_numbers<[1], [0], [0], [1], [0, 0, 1, 1], [], []>} : vector<8x256xbf16>, vector<256x256xbf16>, vector<8x256xf32> -> vector<8x256xf32>
    %c0_16 = arith.constant 0 : index
    %c0_17 = arith.constant 0 : index
    %16 = vector.load %arg5[%c0_16, %c0_17] : memref<1x256xf32, #tpu.memory_space<vmem>>, vector<1x256xf32>
    %17 = vector.broadcast %16 : vector<1x256xf32> to vector<8x256xf32>
    %18 = arith.addf %15, %17 : vector<8x256xf32>
    %cst_18 = arith.constant 0.000000e+00 : f32
    %19 = vector.broadcast %cst_18 : f32 to vector<8x256xf32>
    %20 = arith.maximumf %18, %19 : vector<8x256xf32>
    %21 = arith.truncf %20 : vector<8x256xf32> to vector<8x256xbf16>
    %c0_19 = arith.constant 0 : index
    %c0_20 = arith.constant 0 : index
    %22 = vector.load %arg6[%c0_19, %c0_20] : memref<256x128xbf16, #tpu.memory_space<vmem>>, vector<256x128xbf16>
    %cst_21 = arith.constant dense<0.000000e+00> : vector<8x128xf32>
    %23 = tpu.matmul %21, %22, %cst_21 {dimension_numbers = #tpu.dot_dimension_numbers<[1], [0], [0], [1], [0, 0, 1, 1], [], []>} : vector<8x256xbf16>, vector<256x128xbf16>, vector<8x128xf32> -> vector<8x128xf32>
    %c0_22 = arith.constant 0 : index
    %c0_23 = arith.constant 0 : index
    %24 = vector.load %arg7[%c0_22, %c0_23] : memref<1x128xf32, #tpu.memory_space<vmem>>, vector<1x128xf32>
    %25 = vector.broadcast %24 : vector<1x128xf32> to vector<8x128xf32>
    %26 = arith.addf %23, %25 : vector<8x128xf32>
    %27 = tpu.iota {dimensions = array<i32: 1>} : vector<8x128xi32>
    %c5_i32 = arith.constant 5 : i32
    %28 = vector.broadcast %c5_i32 : i32 to vector<8x128xi32>
    %29 = arith.cmpi slt, %27, %28 : vector<8x128xi32>
    %cst_24 = arith.constant 0xFF800000 : f32
    %30 = vector.broadcast %cst_24 : f32 to vector<8x128xf32>
    %31 = arith.select %29, %26, %30 : vector<8x128xi1>, vector<8x128xf32>
    %cst_25 = arith.constant dense<0xFF800000> : vector<8xf32>
    %32 = vector.multi_reduction <maximumf>, %31, %cst_25 [1] : vector<8x128xf32> to vector<8xf32>
    %33 = vector.shape_cast %32 : vector<8xf32> to vector<8x1xf32>
    %34 = vector.broadcast %33 : vector<8x1xf32> to vector<8x128xf32>
    %35 = arith.cmpf oeq, %31, %34 : vector<8x128xf32>
    %c128_i32 = arith.constant 128 : i32
    %36 = vector.broadcast %c128_i32 : i32 to vector<8x128xi32>
    %37 = arith.select %35, %27, %36 : vector<8x128xi1>, vector<8x128xi32>
    %cst_26 = arith.constant dense<2147483647> : vector<8xi32>
    %38 = vector.multi_reduction <minsi>, %37, %cst_26 [1] : vector<8x128xi32> to vector<8xi32>
    %39 = vector.shape_cast %38 : vector<8xi32> to vector<8x1xi32>
    %c0_27 = arith.constant 0 : index
    %c0_28 = arith.constant 0 : index
    %40 = vector.load %arg8[%c0_27, %c0_28] : memref<8x1xi32, #tpu.memory_space<vmem>>, vector<8x1xi32>
    tpu.vector_store %arg8[%c0_27, %c0_28], %39 {strides = array<i32>} : memref<8x1xi32, #tpu.memory_space<vmem>>, vector<8x1xi32>,
    return
  }
  func.func @transform_0(%arg0: i32) -> (i32, i32) {
    %c0_i32 = arith.constant 0 : i32
    %c0_i32_0 = arith.constant 0 : i32
    return %arg0, %c0_i32 : i32, i32
  }
  func.func @transform_1(%arg0: i32) -> (i32, i32) {
    %c0_i32 = arith.constant 0 : i32
    %c0_i32_0 = arith.constant 0 : i32
    %c0_i32_1 = arith.constant 0 : i32
    return %c0_i32, %c0_i32_0 : i32, i32
  }
  func.func @transform_2(%arg0: i32) -> (i32, i32) {
    %c0_i32 = arith.constant 0 : i32
    %c0_i32_0 = arith.constant 0 : i32
    %c0_i32_1 = arith.constant 0 : i32
    return %c0_i32, %c0_i32_0 : i32, i32
  }
  func.func @transform_3(%arg0: i32) -> (i32, i32) {
    %c0_i32 = arith.constant 0 : i32
    %c0_i32_0 = arith.constant 0 : i32
    %c0_i32_1 = arith.constant 0 : i32
    return %c0_i32, %c0_i32_0 : i32, i32
  }
  func.func @transform_4(%arg0: i32) -> (i32, i32) {
    %c0_i32 = arith.constant 0 : i32
    %c0_i32_0 = arith.constant 0 : i32
    %c0_i32_1 = arith.constant 0 : i32
    return %c0_i32, %c0_i32_0 : i32, i32
  }
  func.func @transform_5(%arg0: i32) -> (i32, i32) {
    %c0_i32 = arith.constant 0 : i32
    %c0_i32_0 = arith.constant 0 : i32
    %c0_i32_1 = arith.constant 0 : i32
    return %c0_i32, %c0_i32_0 : i32, i32
  }
  func.func @transform_6(%arg0: i32) -> (i32, i32) {
    %c0_i32 = arith.constant 0 : i32
    %c0_i32_0 = arith.constant 0 : i32
    %c0_i32_1 = arith.constant 0 : i32
    return %c0_i32, %c0_i32_0 : i32, i32
  }
  func.func @transform_7(%arg0: i32) -> (i32, i32) {
    %c0_i32 = arith.constant 0 : i32
    %c0_i32_0 = arith.constant 0 : i32
    return %arg0, %c0_i32 : i32, i32
  }
}

</mosaic_0001>

<bundles_post_ra>
// kernel: torch_mlp_forward.1
= control target key start
LH: loop header
LB: loop body
LE: loop exit
PB: predicated region body
PF: predicated region fallthrough
CT: control target
= control target key end

     0   :  { %12 = vsyncpa [#allocation4], 0  ;;  %s1089_s0 = inlined_call_operand.hbm [shape: f32[8,25], index: 0, kind: input, shape index: {}]   ;;  %s1090_s1 = inlined_call_operand.hbm [shape: bf16[128,256], index: 1, kind: input, shape index: {}]   ;;  %s1091_s2 = inlined_call_operand.vmem [shape: f32[1,256], index: 2, kind: input, shape index: {}]   ;;  %s1092_s3 = inlined_call_operand.hbm [shape: bf16[256,256], index: 3, kind: input, shape index: {}]   ;;  %s1093_s4 = inlined_call_operand.vmem [shape: f32[1,256], index: 4, kind: input, shape index: {}]   ;;  %s1094_s5 = inlined_call_operand.hbm [shape: bf16[256,128], index: 5, kind: input, shape index: {}]   ;;  %s1095_s6 = inlined_call_operand.vmem [shape: f32[1,128], index: 6, kind: input, shape index: {}]   ;;  %s1096_s7 = inlined_call_operand.vmem [shape: s32[8,1], index: 7, kind: output, shape index: {}]  }
   0x1   :  { %13 = vsyncpa [#allocation6], 0 }
   0x2   :  { %14 = vsyncpa [#allocation9], 0  ;;  %s973_s24 = smov [#allocation5]   ;;  %s879_s28 = scalar_lea.hbm %s1090_s1, 2048 }
   0x3   :  { %s30_s25 = sshll.u32 %s973_s24, 4  ;;  %p880_p0 = scmp.ne.s32.totalorder %s1090_s1, %s879_s28  ;;  %s31_s25 = int_to_ptr.vmem [resolvable:$true] %s30_s25 }
   0x4   :  { %p883_p1 = scmp.lt.u32.totalorder %s879_s28, %s1090_s1 }
   0x6   :  { %p885_p2 = pnand %p883_p1, %p880_p0 }
   0x8   :  { %888 = shalt.err (!%p885_p2)
}
   0x9   :  { %s889_s10 = scalar_lea.vmem %s31_s25, 2048  ;;  %p894_p4 = scmp.lt.s32.totalorder %s31_s25, %s31_s25 }
   0xa   :  { %p890_p3 = scmp.ne.s32.totalorder %s31_s25, %s889_s10  ;;  %p895_p5 = scmp.lt.s32.totalorder %s889_s10, %s889_s10 }
   0xc   :  { %p896_p6 = por %p895_p5, %p894_p4 }
   0xe   :  { %p897_p7 = pnand %p896_p6, %p890_p3 }
  0x10   :  { %900 = shalt.err (!%p897_p7)
}
  0x11   :  { %s974_s11 = smov 128   ;;  %s975_s12 = smov 8  }
  0x12   :  { %36 = dma.hbm_to_vmem [thread:$0]  %s1090_s1, 2048, %s31_s25, [#allocation6], %s974_s11, %s974_s11, %s975_s12  }
  0x13   :  { %s976_s15 = smov [#allocation3]   ;;  %s977_s17 = smov [#allocation7]  }
  0x14   :  { %s21_s16 = sshll.u32 %s976_s15, 4  ;;  %s44_s18 = sshll.u32 %s977_s17, 4  ;;  %s22_s16 = int_to_ptr.vmem [resolvable:$true] %s21_s16  ;;  %s45_s18 = int_to_ptr.vmem [resolvable:$true] %s44_s18 }
  0x15   :  { %s901_s21 = scalar_lea.hbm %s1089_s0, 128 }
  0x16   :  { %p902_p8 = scmp.ne.s32.totalorder %s1089_s0, %s901_s21  ;;  %p905_p9 = scmp.lt.u32.totalorder %s901_s21, %s1089_s0 }
  0x18   :  { %p907_p10 = pnand %p905_p9, %p902_p8 }
  0x1a   :  { %910 = shalt.err (!%p907_p10)
}
  0x1b   :  { %s911_s1 = scalar_lea.vmem %s22_s16, 128  ;;  %p916_p12 = scmp.lt.s32.totalorder %s22_s16, %s22_s16 }
  0x1c   :  { %p912_p11 = scmp.ne.s32.totalorder %s22_s16, %s911_s1  ;;  %p917_p13 = scmp.lt.s32.totalorder %s911_s1, %s911_s1 }
  0x1e   :  { %p918_p0 = por %p917_p13, %p916_p12 }
  0x20   :  { %p919_p1 = pnand %p918_p0, %p912_p11 }
  0x22   :  { %922 = shalt.err (!%p919_p1)
}
  0x23   :  { %24 = dma.hbm_to_vmem [thread:$0]  %s1089_s0, 128, %s22_s16, [#allocation4]  }
  0x24   :  { %s923_s30 = scalar_lea.hbm %s1092_s3, 4096 }
  0x25   :  { %p924_p2 = scmp.ne.s32.totalorder %s1092_s3, %s923_s30  ;;  %p927_p3 = scmp.lt.u32.totalorder %s923_s30, %s1092_s3 }
  0x27   :  { %p929_p4 = pnand %p927_p3, %p924_p2 }
  0x29   :  { %932 = shalt.err (!%p929_p4)
}
  0x2a   :  { %s933_s14 = scalar_lea.vmem %s45_s18, 4096  ;;  %p938_p6 = scmp.lt.s32.totalorder %s45_s18, %s45_s18 }
  0x2b   :  { %p934_p5 = scmp.ne.s32.totalorder %s45_s18, %s933_s14  ;;  %p939_p7 = scmp.lt.s32.totalorder %s933_s14, %s933_s14 }
  0x2d   :  { %p940_p8 = por %p939_p7, %p938_p6 }
  0x2f   :  { %p941_p9 = pnand %p940_p8, %p934_p5 }
  0x31   :  { %944 = shalt.err (!%p941_p9)
}
  0x32   :  { %50 = dma.hbm_to_vmem [thread:$0]  %s1092_s3, 4096, %s45_s18, [#allocation6], %s974_s11, %s974_s11, %s975_s12  }
  0x33   :  { %s978_s16 = smov [#allocation8]   ;;  %s945_s21 = scalar_lea.hbm %s1094_s5, 2048 }
  0x34   :  { %s58_s17 = sshll.u32 %s978_s16, 4  ;;  %p946_p10 = scmp.ne.s32.totalorder %s1094_s5, %s945_s21  ;;  %s59_s17 = int_to_ptr.vmem [resolvable:$true] %s58_s17 }
  0x35   :  { %p949_p11 = scmp.lt.u32.totalorder %s945_s21, %s1094_s5 }
  0x37   :  { %p951_p12 = pnand %p949_p11, %p946_p10 }
  0x39   :  { %954 = shalt.err (!%p951_p12)
}
  0x3a   :  { %s955_s1 = scalar_lea.vmem %s59_s17, 2048  ;;  %p960_p0 = scmp.lt.s32.totalorder %s59_s17, %s59_s17 }
  0x3b   :  { %p956_p13 = scmp.ne.s32.totalorder %s59_s17, %s955_s1  ;;  %p961_p1 = scmp.lt.s32.totalorder %s955_s1, %s955_s1 }
  0x3d   :  { %p962_p2 = por %p961_p1, %p960_p0 }
  0x3f   :  { %p963_p3 = pnand %p962_p2, %p956_p13 }
  0x41   :  { %966 = shalt.err (!%p963_p3)
}
  0x42   :  { %s979_s3 = smov 64   ;;  %s980_s11 = smov 4  }
  0x43   :  { %64 = dma.hbm_to_vmem [thread:$0]  %s1094_s5, 2048, %s59_s17, [#allocation9], %s979_s3, %s979_s3, %s980_s11  }
  0x44   :  { %967 = dma.done.wait [#allocation4], 128  }
  0x45   :  { %968 = vsyncadd [#allocation4], 4294967168 }
  0x46   :  { %969 = dma.done.wait [#allocation6], 6144  }
  0x47   :  { %970 = vsyncadd [#allocation6], 4294961152 }
  0x48   :  { %971 = dma.done.wait [#allocation9], 2048  }
  0x49   :  { %972 = vsyncadd [#allocation9], 4294965248  ;;  %v981_v0 = vmov 0   ;;  %v982_v1 = vmov 0.0   ;;  %v791_v2 = vld [vmem:[#allocation5 + $0x4] ss:$8 sps:$4 sm:$0xff]  }
  0x4a   :  { %226 = vmatprep.mubr.bf16.mxu0 %v981_v0  ;;  %80 = vst [vmem:[#allocation2] sm:$0xff] %v982_v1  ;;  %v793_v3 = vld [vmem:[#allocation5] ss:$8 sps:$4 sm:$0xff]   ;;  %194 = vmatprep.subr.bf16.mxu0 %v791_v2  ;;  %v794_v4 = vld [vmem:[#allocation5 + $0x14] ss:$8 sps:$4 sm:$0xff]   ;;  %vm82_vm0 = vcmask 203776   ;;  %v104_v1 = vlaneseq }
  0x4b   :  { %195 = vmatpush1.bf16.msra.mxu0 %v793_v3  ;;  %v796_v5 = vld [vmem:[#allocation5 + $0x10] ss:$8 sps:$4 sm:$0xff]   ;;  %v797_v6 = vld [vmem:[#allocation5 + $0x24] ss:$8 sps:$4 sm:$0xff]   ;;  %v799_v7 = vld [vmem:[#allocation5 + $0x20] ss:$8 sps:$4 sm:$0xff]  }
  0x4c   :  { %196 = vmatprep.subr.bf16.mxu0 %v794_v4  ;;  %v800_v8 = vld [vmem:[#allocation5 + $0x34] ss:$8 sps:$4 sm:$0xff]   ;;  %v802_v9 = vld [vmem:[#allocation5 + $0x30] ss:$8 sps:$4 sm:$0xff]   ;;  %v803_v10 = vld [vmem:[#allocation5 + $0x44] ss:$8 sps:$4 sm:$0xff]  }
  0x4d   :  { %v81_v11 = vld [vmem:[#allocation3] sm:$0xff]  ;;  %v815_v12 = vld [vmem:[#allocation7 + $0x4] ss:$8 sps:$4 sm:$0xff]   ;;  %v817_v13 = vld [vmem:[#allocation7] ss:$8 sps:$4 sm:$0xff]   ;;  %v105_v2 = vshrl.u32 %v104_v1, 7 }
  0x4e   :  { %83 = vst.msk [vmem:[#allocation2] sm:$0xff] %vm82_vm0, %v81_v11  ;;  %443 = vmatprep.subr.bf16.mxu1 %v815_v12  ;;  %v818_v14 = vld [vmem:[#allocation7 + $0x14] ss:$8 sps:$4 sm:$0xff]   ;;  %v805_v15 = vld [vmem:[#allocation5 + $0x40] ss:$8 sps:$4 sm:$0xff]   ;;  %vm685_vm4 = vcmask 7168  }
  0x4f   :  { %197 = vmatpush1.bf16.msra.mxu0 %v796_v5  ;;  %444 = vmatpush1.bf16.msra.mxu1 %v817_v13  ;;  %v820_v16 = vld [vmem:[#allocation7 + $0x10] ss:$8 sps:$4 sm:$0xff]   ;;  %v821_v17 = vld [vmem:[#allocation7 + $0x24] ss:$8 sps:$4 sm:$0xff]   ;;  %v806_v18 = vld [vmem:[#allocation5 + $0x54] ss:$8 sps:$4 sm:$0xff]  }
  0x50   :  { %198 = vmatprep.subr.bf16.mxu0 %v797_v6  ;;  %445 = vmatprep.subr.bf16.mxu1 %v818_v14  ;;  %v808_v19 = vld [vmem:[#allocation5 + $0x50] ss:$8 sps:$4 sm:$0xff]   ;;  %v823_v20 = vld [vmem:[#allocation7 + $0x20] ss:$8 sps:$4 sm:$0xff]   ;;  %v824_v21 = vld [vmem:[#allocation7 + $0x34] ss:$8 sps:$4 sm:$0xff]  }
  0x51   :  { %v809_v22 = vld [vmem:[#allocation5 + $0x64] ss:$8 sps:$4 sm:$0xff]   ;;  %v811_v23 = vld [vmem:[#allocation5 + $0x60] ss:$8 sps:$4 sm:$0xff]   ;;  %v826_v24 = vld [vmem:[#allocation7 + $0x30] ss:$8 sps:$4 sm:$0xff]  }
  0x52   :  { %v827_v25 = vld [vmem:[#allocation7 + $0x44] ss:$8 sps:$4 sm:$0xff]   ;;  %v812_v26 = vld [vmem:[#allocation5 + $0x74] ss:$8 sps:$4 sm:$0xff]   ;;  %v814_v27 = vld [vmem:[#allocation5 + $0x70] ss:$8 sps:$4 sm:$0xff]  }
  0x53   :  { %199 = vmatpush1.bf16.msra.mxu0 %v799_v7  ;;  %446 = vmatpush1.bf16.msra.mxu1 %v820_v16  ;;  %v829_v28 = vld [vmem:[#allocation7 + $0x40] ss:$8 sps:$4 sm:$0xff]   ;;  %v830_v30 = vld [vmem:[#allocation7 + $0x54] ss:$8 sps:$4 sm:$0xff]   ;;  %v832_v31 = vld [vmem:[#allocation7 + $0x50] ss:$8 sps:$4 sm:$0xff]  }
  0x54   :  { %200 = vmatprep.subr.bf16.mxu0 %v800_v8  ;;  %447 = vmatprep.subr.bf16.mxu1 %v821_v17  ;;  %v833_v33 = vld [vmem:[#allocation7 + $0x64] ss:$8 sps:$4 sm:$0xff]   ;;  %v835_v34 = vld [vmem:[#allocation7 + $0x60] ss:$8 sps:$4 sm:$0xff]   ;;  %v836_v35 = vld [vmem:[#allocation7 + $0x74] ss:$8 sps:$4 sm:$0xff]  }
  0x55   :  { %v84_v29 = vld [vmem:[#allocation2] sm:$0xff]  ;;  %v839_v37 = vld [vmem:[#allocation7 + $0x84] ss:$8 sps:$4 sm:$0xff]   ;;  %v841_v38 = vld [vmem:[#allocation7 + $0x80] ss:$8 sps:$4 sm:$0xff]   ;;  %v106_v3 = vsub.s32 0, %v105_v2 }
  0x56   :  { %v85_v32 = vpack.c.bf16 %v84_v29, %v84_v29  ;;  %v838_v36 = vld [vmem:[#allocation7 + $0x70] ss:$8 sps:$4 sm:$0xff]   ;;  %v842_v39 = vld [vmem:[#allocation7 + $0x94] ss:$8 sps:$4 sm:$0xff]   ;;  %v845_v41 = vld [vmem:[#allocation7 + $0xa4] ss:$8 sps:$4 sm:$0xff]  }
  0x57   :  { %201 = vmatpush1.bf16.msra.mxu0 %v802_v9  ;;  %448 = vmatpush1.bf16.msra.mxu1 %v823_v20  ;;  %v844_v40 = vld [vmem:[#allocation7 + $0x90] ss:$8 sps:$4 sm:$0xff]   ;;  %v847_v42 = vld [vmem:[#allocation7 + $0xa0] ss:$8 sps:$4 sm:$0xff]   ;;  %v848_v43 = vld [vmem:[#allocation7 + $0xb4] ss:$8 sps:$4 sm:$0xff]  }
  0x58   :  { %202 = vmatprep.subr.bf16.mxu0 %v803_v10  ;;  %449 = vmatprep.subr.bf16.mxu1 %v824_v21  ;;  %v850_v44 = vld [vmem:[#allocation7 + $0xb0] ss:$8 sps:$4 sm:$0xff]   ;;  %v851_v45 = vld [vmem:[#allocation7 + $0xc4] ss:$8 sps:$4 sm:$0xff]   ;;  %v853_v46 = vld [vmem:[#allocation7 + $0xc0] ss:$8 sps:$4 sm:$0xff]  }
  0x59   :  { %v854_v47 = vld [vmem:[#allocation7 + $0xd4] ss:$8 sps:$4 sm:$0xff]   ;;  %v856_v48 = vld [vmem:[#allocation7 + $0xd0] ss:$8 sps:$4 sm:$0xff]   ;;  %v857_v49 = vld [vmem:[#allocation7 + $0xe4] ss:$8 sps:$4 sm:$0xff]  }
  0x5a   :  { %v859_v50 = vld [vmem:[#allocation7 + $0xe0] ss:$8 sps:$4 sm:$0xff]   ;;  %v860_v51 = vld [vmem:[#allocation7 + $0xf4] ss:$8 sps:$4 sm:$0xff]   ;;  %v862_v52 = vld [vmem:[#allocation7 + $0xf0] ss:$8 sps:$4 sm:$0xff]  }
  0x5b   :  { %203 = vmatpush1.bf16.msra.mxu0 %v805_v15  ;;  %450 = vmatpush1.bf16.msra.mxu1 %v826_v24  ;;  %v863_v53 = vld [vmem:[#allocation8 + $0x40] sm:$0xff]   ;;  %v865_v55 = vld [vmem:[#allocation8 + $0x48] sm:$0xff]   ;;  %v867_v57 = vld [vmem:[#allocation8 + $0x50] sm:$0xff]   ;;  %v110_v5 = vsub.s32 1, %v105_v2 }
  0x5c   :  { %204 = vmatprep.subr.bf16.mxu0 %v806_v18  ;;  %451 = vmatprep.subr.bf16.mxu1 %v827_v25  ;;  %v864_v54 = vld [vmem:[#allocation8] sm:$0xff]   ;;  %v866_v56 = vld [vmem:[#allocation8 + $0x8] sm:$0xff]   ;;  %v868_v58 = vld [vmem:[#allocation8 + $0x10] sm:$0xff]  }
  0x5d   :  { %v869_v59 = vld [vmem:[#allocation8 + $0x58] sm:$0xff]   ;;  %v871_v61 = vld [vmem:[#allocation8 + $0x60] sm:$0xff]   ;;  %v873_v63 = vld [vmem:[#allocation8 + $0x68] sm:$0xff]  }
  0x5e   :  { %v870_v60 = vld [vmem:[#allocation8 + $0x18] sm:$0xff]   ;;  %v872_v62 = vld [vmem:[#allocation8 + $0x20] sm:$0xff]   ;;  %v874_v0 = vld [vmem:[#allocation8 + $0x28] sm:$0xff]  }
  0x5f   :  { %205 = vmatpush1.bf16.msra.mxu0 %v808_v19  ;;  %452 = vmatpush1.bf16.msra.mxu1 %v829_v28  ;;  %v102_v4 = vld [vmem:[%s1091_s2] sm:$0x3]  ;;  %v877_v20 = vld [vmem:[#allocation8 + $0x78] sm:$0xff]  }
  0x60   :  { %206 = vmatprep.subr.bf16.mxu0 %v809_v22  ;;  %453 = vmatprep.subr.bf16.mxu1 %v830_v30  ;;  %v107_v6 = vrot.slane %v102_v4, %v106_v3  ;;  %v111_v7 = vrot.slane %v102_v4, %v110_v5  ;;  %v875_v18 = vld [vmem:[#allocation8 + $0x70] sm:$0xff]   ;;  %v878_v21 = vld [vmem:[#allocation8 + $0x38] sm:$0xff]  }
  0x61   :  { %v876_v19 = vld [vmem:[#allocation8 + $0x30] sm:$0xff]  }
  0x62   :  { %v271_v22 = vld [vmem:[%s1093_s4] sm:$0x3] }
  0x63   :  { %207 = vmatpush1.bf16.msra.mxu0 %v811_v23  ;;  %454 = vmatpush1.bf16.msra.mxu1 %v832_v31  ;;  %v276_v23 = vrot.slane %v271_v22, %v106_v3  ;;  %v280_v24 = vrot.slane %v271_v22, %v110_v5 }
  0x64   :  { %208 = vmatprep.subr.bf16.mxu0 %v812_v26  ;;  %455 = vmatprep.subr.bf16.mxu1 %v833_v33 }
  0x67   :  { %209 = vmatpush1.bf16.msra.mxu0 %v814_v27  ;;  %456 = vmatpush1.bf16.msra.mxu1 %v835_v34 }
  0x68   :  { %457 = vmatprep.subr.bf16.mxu1 %v836_v35  ;;  %759 = vmatprep.subr.bf16.mxu0 %v863_v53  ;;  %v664_v35 = vand.u32 127, %v104_v1 }
  0x6a   :  { %227 = vmatmul.mubr.bf16.vlgmr.msra.gmra.mrb[0].mxu0 %v85_v32  ;;  %vm665_vm1 = vcmp.lt.s32.totalorder %v664_v35, 5 }
  0x6b   :  { %458 = vmatpush1.bf16.msra.mxu1 %v838_v36  ;;  %760 = vmatpush3.bf16.msra.mxu0 %v864_v54 }
  0x6c   :  { %459 = vmatprep.subr.bf16.mxu1 %v839_v37  ;;  %761 = vmatprep.subr.bf16.mxu0 %v865_v55 }
  0x6f   :  { %460 = vmatpush1.bf16.msra.mxu1 %v841_v38  ;;  %762 = vmatpush3.bf16.msra.mxu0 %v866_v56  ;;  %v742_v38 = vld [vmem:[%s1095_s6] ss:$0 sm:$0xff] }
  0x70   :  { %461 = vmatprep.subr.bf16.mxu1 %v842_v39  ;;  %763 = vmatprep.subr.bf16.mxu0 %v867_v57 }
  0x73   :  { %462 = vmatpush1.bf16.msra.mxu1 %v844_v40  ;;  %764 = vmatpush3.bf16.msra.mxu0 %v868_v58 }
  0x74   :  { %463 = vmatprep.subr.bf16.mxu1 %v845_v41  ;;  %765 = vmatprep.subr.bf16.mxu0 %v869_v59 }
  0x77   :  { %464 = vmatpush1.bf16.msra.mxu1 %v847_v42  ;;  %766 = vmatpush3.bf16.msra.mxu0 %v870_v60 }
  0x78   :  { %465 = vmatprep.subr.bf16.mxu1 %v848_v43  ;;  %767 = vmatprep.subr.bf16.mxu0 %v871_v61 }
  0x7b   :  { %466 = vmatpush1.bf16.msra.mxu1 %v850_v44  ;;  %768 = vmatpush3.bf16.msra.mxu0 %v872_v62 }
  0x7c   :  { %467 = vmatprep.subr.bf16.mxu1 %v851_v45  ;;  %769 = vmatprep.subr.bf16.mxu0 %v873_v63 }
  0x7f   :  { %468 = vmatpush1.bf16.msra.mxu1 %v853_v46  ;;  %770 = vmatpush3.bf16.msra.mxu0 %v874_v0 }
  0x80   :  { %469 = vmatprep.subr.bf16.mxu1 %v854_v47  ;;  %771 = vmatprep.subr.bf16.mxu0 %v875_v18 }
  0x83   :  { %470 = vmatpush1.bf16.msra.mxu1 %v856_v48  ;;  %772 = vmatpush3.bf16.msra.mxu0 %v876_v19 }
  0x84   :  { %471 = vmatprep.subr.bf16.mxu1 %v857_v49  ;;  %773 = vmatprep.subr.bf16.mxu0 %v877_v20 }
  0x87   :  { %472 = vmatpush1.bf16.msra.mxu1 %v859_v50  ;;  %774 = vmatpush3.bf16.msra.mxu0 %v878_v21 }
  0x88   :  { %473 = vmatprep.subr.bf16.mxu1 %v860_v51 }
  0x8b   :  { %474 = vmatpush1.bf16.msra.mxu1 %v862_v52 }
 0x13d   :  { %v228_v8 = vpop.f32.mrb[0].mxu0 }
 0x13e   :  { %v229_v9 = vadd.f32 %v228_v8, %v107_v6  ;;  %v230_v10 = vpop.f32.mrb[1].mxu0 }
 0x13f   :  { %v231_v11 = vadd.f32 %v230_v10, %v111_v7  ;;  %v232_v12 = vpop.f32.mrb[2].mxu0 }
 0x140   :  { %v235_v13 = vmax.f32 %v229_v9, 0.0  ;;  %v233_v14 = vpop.f32.mrb[3].mxu0 }
 0x141   :  { %v236_v15 = vmax.f32 %v231_v11, 0.0 }
 0x142   :  { %v237_v17 = vpack.c.bf16 %v235_v13, %v235_v13 }
 0x143   :  { %v238_v16 = vpack.c.bf16 %v236_v15, %v236_v15 }
 0x145   :  { %475 = vmatprep.mubr.bf16.mxu1 %v238_v16 }
 0x146   :  { %476 = vmatmul.mubr.bf16.vlgmr.msra.gmra.mrb[0].mxu1 %v237_v17 }
 0x219   :  { %v477_v25 = vpop.f32.mrb[0].mxu1 }
 0x21a   :  { %v478_v26 = vadd.f32 %v477_v25, %v276_v23  ;;  %v479_v27 = vpop.f32.mrb[1].mxu1 }
 0x21b   :  { %v480_v28 = vadd.f32 %v479_v27, %v280_v24  ;;  %v481_v29 = vpop.f32.mrb[2].mxu1 }
 0x21c   :  { %v484_v30 = vmax.f32 %v478_v26, 0.0  ;;  %v482_v31 = vpop.f32.mrb[3].mxu1 }
 0x21d   :  { %v485_v32 = vmax.f32 %v480_v28, 0.0 }
 0x21e   :  { %v486_v34 = vpack.c.bf16 %v484_v30, %v484_v30 }
 0x21f   :  { %v487_v33 = vpack.c.bf16 %v485_v32, %v485_v32 }
 0x221   :  { %655 = vmatprep.mubr.bf16.mxu0 %v487_v33 }
 0x222   :  { %656 = vmatmul.mubr.bf16.vlgmr.msra.gmra.mrb[4].mxu0 %v486_v34 }
 0x2f5   :  { %v775_v36 = vpop.f32.mrb[4].mxu0 }
 0x2f6   :  { %v776_v37 = vpop.f32.mrb[5].mxu0 }
 0x2f7   :  { %v777_v39 = vadd.f32 %v776_v37, %v775_v36  ;;  %v778_v40 = vpop.f32.mrb[6].mxu0 }
 0x2f8   :  { %v779_v41 = vpop.f32.mrb[7].mxu0 }
 0x2f9   :  { %v658_v42 = vadd.f32 %v777_v39, %v742_v38 }
 0x2fb   :  { %v666_v43 = vsel %vm665_vm1, %v658_v42, -inf }
 0x2fc   :  { %667 = vmax.xlane.f32.xlu0 %v666_v43 }
 0x389   :  { %v668_v44 = vpop.xlane.xlu0 %667 }
 0x38a   :  { %vm669_vm2 = vcmp.eq.f32.partialorder %v666_v43, %v668_v44 }
 0x38b   :  { %v670_v45 = vsel %vm669_vm2, %v664_v35, 128 }
 0x38c   :  { %v672_v46 = vshra.s32 %v670_v45, 16  ;;  %v671_v48 = vand.u32 65535, %v670_v45 }
 0x38e   :  { %v674_v47 = vcvt.s32.f32 %v672_v46  ;;  %v673_v50 = vcvt.s32.f32 %v671_v48 }
 0x390   :  { %675 = vmin.xlane.f32.xlu0 %v674_v47 }
 0x41d   :  { %v676_v49 = vpop.xlane.xlu0 %675 }
 0x41e   :  { %vm677_vm3 = vcmp.eq.f32.partialorder %v674_v47, %v676_v49  ;;  %v682_v52 = vcvt.f32.s32 %v676_v49 }
 0x41f   :  { %v678_v51 = vsel %vm677_vm3, %v673_v50, inf }
 0x420   :  { %679 = vmin.xlane.f32.xlu1 %v678_v51  ;;  %v683_v54 = vshll.u32 %v682_v52, 16 }
 0x4ad   :  { %v680_v53 = vpop.xlane.xlu1 %679 }
 0x4ae   :  { %v681_v55 = vcvt.f32.s32 %v680_v53 }
 0x4b0   :  { %v684_v56 = vadd.s32 %v683_v54, %v681_v55 }
 0x4b2   :  { %686 = vst.msk [vmem:[%s1096_s7] sm:$0xff] %vm685_vm4, %v684_v56 }
 0x4b3   :  { %691 = vsyncpa [#allocation4], 1 }
 0x4b4   :  { %692 = vsyncpa [#allocation6], 1 }
 0x4b5   :  { %693 = vsyncpa [#allocation9], 1 }

</bundles_post_ra>
